<compile_context>
chip_gen: v7x
topology: tpu7x:2x2x1
jax: 0.10.0
libtpu: 0.0.40
codegen_flags: <defaults>
</compile_context>

<pallas_src>
import functools

import jax
import jax.numpy as jnp
from jax.experimental import pallas as pl
from jax.experimental.pallas import tpu as pltpu


def _round_up(x, m):
    return (x + m - 1) // m * m


# ------------- prologue kernel: per-class cell-embedding table ---------------

def _cell_table_kernel(nbr_ref,                       # scalar prefetch (SMEM)
                       emb_ref, agg_w_ref, agg_b_ref,  # resident VMEM inputs
                       out_ref,                        # (C_pad, E) f32
                       feat_ref,                       # scratch (C_pad, 2*E*n_hop) f32
                       *, num_classes, n_hop, n_memory):
    f32 = jnp.float32
    bf16 = jnp.bfloat16
    emb_dim = emb_ref.shape[1]
    inv_m = jnp.float32(1.0 / n_memory)

    # Zero the feature matrix (padded class rows stay 0; they are never
    # selected by the one-hot lookup in the main kernel).
    feat_ref[...] = jnp.zeros_like(feat_ref)

    # Gather + mean/max per (class, hop) from the resident embedding table.
    # Total rows = num_classes * n_hop * n_memory (64 in the test config) --
    # independent of batch size.
    for c in range(num_classes):
        for h in range(n_hop):
            base = (c * n_hop + h) * n_memory
            row = emb_ref[pl.ds(nbr_ref[base], 1), :]        # (1, E) f32
            s = row
            mx = row
            for m in range(1, n_memory):
                row = emb_ref[pl.ds(nbr_ref[base + m], 1), :]
                s = s + row
                mx = jnp.maximum(mx, row)
            off = h * 2 * emb_dim
            # torch layout per hop: [mean | max], hops concatenated.
            feat_ref[c:c + 1, off:off + emb_dim] = s * inv_m
            feat_ref[c:c + 1, off + emb_dim:off + 2 * emb_dim] = mx

    # Single fused aggregation matmul: (C_pad, 2*E*n_hop) @ (2*E*n_hop, E).
    out_ref[...] = (jnp.dot(feat_ref[...].astype(bf16), agg_w_ref[...],
                            preferred_element_type=f32) + agg_b_ref[...])


# ------------------- main kernel: batched MLP head ---------------------------

def _mlp_head_kernel(ht_ref, cells_ref, ctab_ref,
                     w1ht_ref, w1c_ref, b1_ref,
                     w2_ref, b2_ref, ow_ref, ob_ref,
                     o_ref):
    f32 = jnp.float32
    bf16 = jnp.bfloat16
    tb = ht_ref.shape[0]
    c_pad = ctab_ref.shape[0]

    # Cell-embedding lookup as a one-hot matmul against the tiny de-duplicated
    # per-class table (no scalar loops, no gather DMAs).
    onehot = (cells_ref[...] == jax.lax.broadcasted_iota(
        jnp.int32, (tb, c_pad), 1)).astype(bf16)              # (tb, C_pad)
    cell_emb = jnp.dot(onehot, ctab_ref[...],
                       preferred_element_type=f32)            # (tb, E) f32

    # fc1: one fused heads|tails matmul + one small cell-block matmul
    # (no in-kernel lane concatenation), then ReLU.  Dropout = identity (eval).
    h1 = jnp.maximum(
        jnp.dot(ht_ref[...], w1ht_ref[...], preferred_element_type=f32)
        + jnp.dot(cell_emb.astype(bf16), w1c_ref[...],
                  preferred_element_type=f32)
        + b1_ref[...], 0.0)

    # fc2 -> ReLU.
    h2 = jnp.maximum(
        jnp.dot(h1.astype(bf16), w2_ref[...], preferred_element_type=f32)
        + b2_ref[...], 0.0)

    # Lane-dense output: (1, tb) = out_w (1, E) contracted against h2 (tb, E).
    logits = jax.lax.dot_general(
        ow_ref[...], h2.astype(bf16),
        dimension_numbers=(((1,), (1,)), ((), ())),
        preferred_element_type=f32) + ob_ref[...]
    o_ref[...] = logits.astype(o_ref.dtype)


# ------------------------------- wrapper --------------------------------------

def binary_class_mlp_ppi_v2_head(heads, tails, cells, params, neighbor_table,
                                 *, n_hop, n_memory):
    """heads/tails: [B, input_dim] f32, cells: [B, 1] i32 -> [B, 1] f32."""
    bf16 = jnp.bfloat16
    f32 = jnp.float32
    batch, input_dim = heads.shape
    protein_num, emb_dim = params["emb"].shape
    num_classes = neighbor_table.shape[0]
    assert neighbor_table.shape[1:] == (n_hop, n_memory)

    # ---------- prologue: de-duplicated per-class cell embedding -------------
    c_pad = _round_up(num_classes, 8)
    nbr_flat = neighbor_table.astype(jnp.int32).reshape(-1)    # SMEM prefetch
    emb_f32 = params["emb"].astype(f32)                        # resident VMEM
    agg_w = params["agg_w"].astype(bf16)                       # (2*E*n_hop, E)
    agg_b = params["agg_b"].astype(f32)                        # (1, E)

    cell_kernel = functools.partial(
        _cell_table_kernel, num_classes=num_classes, n_hop=n_hop,
        n_memory=n_memory)

    cell_table = pl.pallas_call(
        cell_kernel,
        out_shape=jax.ShapeDtypeStruct((c_pad, emb_dim), f32),
        grid_spec=pltpu.PrefetchScalarGridSpec(
            num_scalar_prefetch=1,
            grid=(1,),
            in_specs=[
                pl.BlockSpec((protein_num, emb_dim), lambda i, *_: (0, 0)),
                pl.BlockSpec(agg_w.shape, lambda i, *_: (0, 0)),
                pl.BlockSpec(agg_b.shape, lambda i, *_: (0, 0)),
            ],
            out_specs=pl.BlockSpec((c_pad, emb_dim), lambda i, *_: (0, 0)),
            scratch_shapes=[pltpu.VMEM((c_pad, 2 * emb_dim * n_hop), f32)],
        ),
        compiler_params=pltpu.CompilerParams(
            dimension_semantics=("arbitrary",)),
    )(nbr_flat, emb_f32, agg_w, agg_b)

    # ---------- batch tiling --------------------------------------------------
    # Small batches: one sublane-aligned tile.  Larger batches: >=2 tiles of a
    # 128-multiple (lane-dense output blocks + both v7x TensorCores used).
    if batch <= 128:
        b_pad = _round_up(batch, 8)
        tb = b_pad
    else:
        tb = min(512, _round_up((batch + 1) // 2, 128))
        b_pad = _round_up(batch, tb)
    pad = b_pad - batch

    ht_cat = jnp.pad(jnp.concatenate([heads, tails], axis=1),
                     ((0, pad), (0, 0))).astype(bf16)           # (b_pad, 2*in)
    cells_p = jnp.pad(cells.astype(jnp.int32), ((0, pad), (0, 0)))  # (b_pad, 1)

    fc1_w = params["fc1_w"].astype(bf16)                        # (2*in+E, in)
    w1_ht = fc1_w[:2 * input_dim]                               # (2*in, in)
    w1_cell = fc1_w[2 * input_dim:]                             # (E, in)
    fc1_b = params["fc1_b"].astype(f32)
    fc2_w = params["fc2_w"].astype(bf16)
    fc2_b = params["fc2_b"].astype(f32)
    out_w_row = params["out_w"].astype(bf16).T                  # (1, E)
    out_b = params["out_b"].astype(f32)                         # (1, 1)
    ctab_bf16 = cell_table.astype(bf16)                         # (C_pad, E)

    def resident(x):                       # whole array, same block every step
        nd = x.ndim
        return pl.BlockSpec(x.shape, lambda i: (0,) * nd)

    out_row = pl.pallas_call(
        _mlp_head_kernel,
        out_shape=jax.ShapeDtypeStruct((1, b_pad), f32),
        grid_spec=pltpu.PrefetchScalarGridSpec(
            num_scalar_prefetch=0,
            grid=(b_pad // tb,),
            in_specs=[
                pl.BlockSpec((tb, 2 * input_dim), lambda i: (i, 0)),
                pl.BlockSpec((tb, 1), lambda i: (i, 0)),
                resident(ctab_bf16),
                resident(w1_ht), resident(w1_cell), resident(fc1_b),
                resident(fc2_w), resident(fc2_b),
                resident(out_w_row), resident(out_b),
            ],
            out_specs=pl.BlockSpec((1, tb), lambda i: (0, i)),
        ),
        compiler_params=pltpu.CompilerParams(
            dimension_semantics=("parallel",)),
    )(ht_cat, cells_p, ctab_bf16, w1_ht, w1_cell, fc1_b,
      fc2_w, fc2_b, out_w_row, out_b)

    return out_row[0, :batch].reshape(batch, 1)


# --------------------------- deterministic params ----------------------------

def _linear_params(key, fan_in, fan_out):
    kw, kb = jax.random.split(key)
    bound = 1.0 / jnp.sqrt(jnp.float32(fan_in))
    w = jax.random.uniform(kw, (fan_in, fan_out), jnp.float32, -bound, bound)
    b = jax.random.uniform(kb, (1, fan_out), jnp.float32, -bound, bound)
    return w, b


def init_params(key, *, input_dim, inner_dim, n_hop, protein_num):
    keys = jax.random.split(key, 5)
    emb = jax.random.normal(keys[0], (protein_num, inner_dim), jnp.float32)
    agg_w, agg_b = _linear_params(keys[1], inner_dim * 2 * n_hop, inner_dim)
    fc1_w, fc1_b = _linear_params(keys[2], 2 * input_dim + inner_dim, input_dim)
    fc2_w, fc2_b = _linear_params(keys[3], input_dim, inner_dim)
    out_w, out_b = _linear_params(keys[4], inner_dim, 1)
    return dict(emb=emb, agg_w=agg_w, agg_b=agg_b, fc1_w=fc1_w, fc1_b=fc1_b,
                fc2_w=fc2_w, fc2_b=fc2_b, out_w=out_w, out_b=out_b)


# ---------------------------- pure-JAX reference ------------------------------
# Mirrors the torch forward structure and the kernels' bf16-operand / f32-
# accumulation numerics.

def reference_forward(heads, tails, cells, params, neighbor_table,
                      *, n_hop, n_memory):
    bf16, f32 = jnp.bfloat16, jnp.float32

    def mm(a, b):
        return jnp.dot(a.astype(bf16), b.astype(bf16),
                       preferred_element_type=f32)

    heads = heads.astype(bf16).astype(f32)
    tails = tails.astype(bf16).astype(f32)
    cn = neighbor_table[cells[:, 0]]            # [B, n_hop, M]
    emb = params["emb"][cn]                     # [B, n_hop, M, E] f32
    feats = []
    for hop in range(n_hop):
        e = emb[:, hop]                         # [B, M, E]
        feats.append(jnp.concatenate([e.mean(axis=1), e.max(axis=1)], axis=-1))
    cell_cat = jnp.concatenate(feats, axis=1)   # [B, 2E*n_hop]
    cell_emb = mm(cell_cat, params["agg_w"]) + params["agg_b"]
    xc = jnp.concatenate([heads, tails, cell_emb], axis=1)
    h1 = jnp.maximum(mm(xc, params["fc1_w"]) + params["fc1_b"], 0.0)
    h2 = jnp.maximum(mm(h1, params["fc2_w"]) + params["fc2_b"], 0.0)
    return mm(h2, params["out_w"]) + params["out_b"]


# ---------------------------------- main --------------------------------------

if __name__ == "__main__":
    INPUT_DIM = 32      # drug feature dim (heads / tails)
    INNER_DIM = 16      # emb_dim
    NUM_CLASSES = 4     # number of cell lines
    N_HOP = 2
    N_MEMORY = 8
    PROTEIN_NUM = 64
    BATCH = 2

    root = jax.random.PRNGKey(0)
    k_par, k_nbr, k_h, k_t, k_c = jax.random.split(root, 5)

    params = init_params(k_par, input_dim=INPUT_DIM, inner_dim=INNER_DIM,
                         n_hop=N_HOP, protein_num=PROTEIN_NUM)

    # Deterministic stand-in for DataPPI.get_cell_neighbor_set().
    neighbor_table = jax.random.randint(
        k_nbr, (NUM_CLASSES, N_HOP, N_MEMORY), 0, PROTEIN_NUM, dtype=jnp.int32)

    heads = jax.random.normal(k_h, (BATCH, INPUT_DIM), jnp.float32)
    tails = jax.random.normal(k_t, (BATCH, INPUT_DIM), jnp.float32)
    cells = jax.random.randint(k_c, (BATCH, 1), 0, NUM_CLASSES, dtype=jnp.int32)

    out = binary_class_mlp_ppi_v2_head(
        heads, tails, cells, params, neighbor_table,
        n_hop=N_HOP, n_memory=N_MEMORY)
    out = jax.block_until_ready(out)

    ref = reference_forward(heads, tails, cells, params, neighbor_table,
                            n_hop=N_HOP, n_memory=N_MEMORY)
    assert out.shape == (BATCH, 1)
    assert jnp.allclose(out, ref, atol=1e-2, rtol=1e-2), (out, ref)
    print("KERNEL_OK")
</pallas_src>

<mosaic_0001>
module attributes {stable_mosaic.version = 11 : i64} {
  func.func @_cell_table_kernel(%arg0: i32, %arg1: memref<64xi32, #tpu.memory_space<smem>>, %arg2: memref<64x16xf32, #tpu.memory_space<vmem>>, %arg3: memref<64x16xbf16, #tpu.memory_space<vmem>>, %arg4: memref<1x16xf32, #tpu.memory_space<vmem>>, %arg5: memref<8x16xf32, #tpu.memory_space<vmem>>, %arg6: memref<8x64xf32, #tpu.memory_space<vmem>>) attributes {dimension_semantics = [#tpu.dimension_semantics<arbitrary>], iteration_bounds = array<i64: 1>, scalar_prefetch = 1 : i64, scratch_operands = 1 : i64, tpu.core_type = #tpu.core_type<tc>, window_params = [{pipeline_mode = #tpu.pipeline_mode<synchronous>, transform_indices = @transform_0, window_bounds = array<i64: 64, 16>}, {pipeline_mode = #tpu.pipeline_mode<synchronous>, transform_indices = @transform_1, window_bounds = array<i64: 64, 16>}, {pipeline_mode = #tpu.pipeline_mode<synchronous>, transform_indices = @transform_2, window_bounds = array<i64: 1, 16>}, {pipeline_mode = #tpu.pipeline_mode<synchronous>, transform_indices = @transform_3, window_bounds = array<i64: 8, 16>}]} {
    %cst = arith.constant 0.000000e+00 : f32
    %0 = vector.broadcast %cst : f32 to vector<8x64xf32>
    %c0 = arith.constant 0 : index
    %c0_0 = arith.constant 0 : index
    %1 = vector.load %arg6[%c0, %c0_0] : memref<8x64xf32, #tpu.memory_space<vmem>>, vector<8x64xf32>
    tpu.vector_store %arg6[%c0, %c0_0], %0 {strides = array<i32>} : memref<8x64xf32, #tpu.memory_space<vmem>>, vector<8x64xf32>,
    %c0_1 = arith.constant 0 : index
    %2 = memref.load %arg1[%c0_1] : memref<64xi32, #tpu.memory_space<smem>>
    %3 = arith.index_cast %2 : i32 to index
    %c0_2 = arith.constant 0 : index
    %4 = vector.load %arg2[%3, %c0_2] : memref<64x16xf32, #tpu.memory_space<vmem>>, vector<1x16xf32>
    %c1 = arith.constant 1 : index
    %5 = memref.load %arg1[%c1] : memref<64xi32, #tpu.memory_space<smem>>
    %6 = arith.index_cast %5 : i32 to index
    %c0_3 = arith.constant 0 : index
    %7 = vector.load %arg2[%6, %c0_3] : memref<64x16xf32, #tpu.memory_space<vmem>>, vector<1x16xf32>
    %8 = arith.addf %4, %7 : vector<1x16xf32>
    %9 = arith.maximumf %4, %7 : vector<1x16xf32>
    %c2 = arith.constant 2 : index
    %10 = memref.load %arg1[%c2] : memref<64xi32, #tpu.memory_space<smem>>
    %11 = arith.index_cast %10 : i32 to index
    %c0_4 = arith.constant 0 : index
    %12 = vector.load %arg2[%11, %c0_4] : memref<64x16xf32, #tpu.memory_space<vmem>>, vector<1x16xf32>
    %13 = arith.addf %8, %12 : vector<1x16xf32>
    %14 = arith.maximumf %9, %12 : vector<1x16xf32>
    %c3 = arith.constant 3 : index
    %15 = memref.load %arg1[%c3] : memref<64xi32, #tpu.memory_space<smem>>
    %16 = arith.index_cast %15 : i32 to index
    %c0_5 = arith.constant 0 : index
    %17 = vector.load %arg2[%16, %c0_5] : memref<64x16xf32, #tpu.memory_space<vmem>>, vector<1x16xf32>
    %18 = arith.addf %13, %17 : vector<1x16xf32>
    %19 = arith.maximumf %14, %17 : vector<1x16xf32>
    %c4 = arith.constant 4 : index
    %20 = memref.load %arg1[%c4] : memref<64xi32, #tpu.memory_space<smem>>
    %21 = arith.index_cast %20 : i32 to index
    %c0_6 = arith.constant 0 : index
    %22 = vector.load %arg2[%21, %c0_6] : memref<64x16xf32, #tpu.memory_space<vmem>>, vector<1x16xf32>
    %23 = arith.addf %18, %22 : vector<1x16xf32>
    %24 = arith.maximumf %19, %22 : vector<1x16xf32>
    %c5 = arith.constant 5 : index
    %25 = memref.load %arg1[%c5] : memref<64xi32, #tpu.memory_space<smem>>
    %26 = arith.index_cast %25 : i32 to index
    %c0_7 = arith.constant 0 : index
    %27 = vector.load %arg2[%26, %c0_7] : memref<64x16xf32, #tpu.memory_space<vmem>>, vector<1x16xf32>
    %28 = arith.addf %23, %27 : vector<1x16xf32>
    %29 = arith.maximumf %24, %27 : vector<1x16xf32>
    %c6 = arith.constant 6 : index
    %30 = memref.load %arg1[%c6] : memref<64xi32, #tpu.memory_space<smem>>
    %31 = arith.index_cast %30 : i32 to index
    %c0_8 = arith.constant 0 : index
    %32 = vector.load %arg2[%31, %c0_8] : memref<64x16xf32, #tpu.memory_space<vmem>>, vector<1x16xf32>
    %33 = arith.addf %28, %32 : vector<1x16xf32>
    %34 = arith.maximumf %29, %32 : vector<1x16xf32>
    %c7 = arith.constant 7 : index
    %35 = memref.load %arg1[%c7] : memref<64xi32, #tpu.memory_space<smem>>
    %36 = arith.index_cast %35 : i32 to index
    %c0_9 = arith.constant 0 : index
    %37 = vector.load %arg2[%36, %c0_9] : memref<64x16xf32, #tpu.memory_space<vmem>>, vector<1x16xf32>
    %38 = arith.addf %33, %37 : vector<1x16xf32>
    %39 = arith.maximumf %34, %37 : vector<1x16xf32>
    %cst_10 = arith.constant 1.250000e-01 : f32
    %40 = vector.broadcast %cst_10 : f32 to vector<1x16xf32>
    %41 = arith.mulf %38, %40 : vector<1x16xf32>
    %c0_11 = arith.constant 0 : index
    %c0_12 = arith.constant 0 : index
    %42 = vector.load %arg6[%c0_11, %c0_12] : memref<8x64xf32, #tpu.memory_space<vmem>>, vector<1x16xf32>
    tpu.vector_store %arg6[%c0_11, %c0_12], %41 {strides = array<i32>} : memref<8x64xf32, #tpu.memory_space<vmem>>, vector<1x16xf32>,
    %c0_13 = arith.constant 0 : index
    %c16 = arith.constant 16 : index
    %43 = vector.load %arg6[%c0_13, %c16] : memref<8x64xf32, #tpu.memory_space<vmem>>, vector<1x16xf32>
    tpu.vector_store %arg6[%c0_13, %c16], %39 {strides = array<i32>} : memref<8x64xf32, #tpu.memory_space<vmem>>, vector<1x16xf32>,
    %c8 = arith.constant 8 : index
    %44 = memref.load %arg1[%c8] : memref<64xi32, #tpu.memory_space<smem>>
    %45 = arith.index_cast %44 : i32 to index
    %c0_14 = arith.constant 0 : index
    %46 = vector.load %arg2[%45, %c0_14] : memref<64x16xf32, #tpu.memory_space<vmem>>, vector<1x16xf32>
    %c9 = arith.constant 9 : index
    %47 = memref.load %arg1[%c9] : memref<64xi32, #tpu.memory_space<smem>>
    %48 = arith.index_cast %47 : i32 to index
    %c0_15 = arith.constant 0 : index
    %49 = vector.load %arg2[%48, %c0_15] : memref<64x16xf32, #tpu.memory_space<vmem>>, vector<1x16xf32>
    %50 = arith.addf %46, %49 : vector<1x16xf32>
    %51 = arith.maximumf %46, %49 : vector<1x16xf32>
    %c10 = arith.constant 10 : index
    %52 = memref.load %arg1[%c10] : memref<64xi32, #tpu.memory_space<smem>>
    %53 = arith.index_cast %52 : i32 to index
    %c0_16 = arith.constant 0 : index
    %54 = vector.load %arg2[%53, %c0_16] : memref<64x16xf32, #tpu.memory_space<vmem>>, vector<1x16xf32>
    %55 = arith.addf %50, %54 : vector<1x16xf32>
    %56 = arith.maximumf %51, %54 : vector<1x16xf32>
    %c11 = arith.constant 11 : index
    %57 = memref.load %arg1[%c11] : memref<64xi32, #tpu.memory_space<smem>>
    %58 = arith.index_cast %57 : i32 to index
    %c0_17 = arith.constant 0 : index
    %59 = vector.load %arg2[%58, %c0_17] : memref<64x16xf32, #tpu.memory_space<vmem>>, vector<1x16xf32>
    %60 = arith.addf %55, %59 : vector<1x16xf32>
    %61 = arith.maximumf %56, %59 : vector<1x16xf32>
    %c12 = arith.constant 12 : index
    %62 = memref.load %arg1[%c12] : memref<64xi32, #tpu.memory_space<smem>>
    %63 = arith.index_cast %62 : i32 to index
    %c0_18 = arith.constant 0 : index
    %64 = vector.load %arg2[%63, %c0_18] : memref<64x16xf32, #tpu.memory_space<vmem>>, vector<1x16xf32>
    %65 = arith.addf %60, %64 : vector<1x16xf32>
    %66 = arith.maximumf %61, %64 : vector<1x16xf32>
    %c13 = arith.constant 13 : index
    %67 = memref.load %arg1[%c13] : memref<64xi32, #tpu.memory_space<smem>>
    %68 = arith.index_cast %67 : i32 to index
    %c0_19 = arith.constant 0 : index
    %69 = vector.load %arg2[%68, %c0_19] : memref<64x16xf32, #tpu.memory_space<vmem>>, vector<1x16xf32>
    %70 = arith.addf %65, %69 : vector<1x16xf32>
    %71 = arith.maximumf %66, %69 : vector<1x16xf32>
    %c14 = arith.constant 14 : index
    %72 = memref.load %arg1[%c14] : memref<64xi32, #tpu.memory_space<smem>>
    %73 = arith.index_cast %72 : i32 to index
    %c0_20 = arith.constant 0 : index
    %74 = vector.load %arg2[%73, %c0_20] : memref<64x16xf32, #tpu.memory_space<vmem>>, vector<1x16xf32>
    %75 = arith.addf %70, %74 : vector<1x16xf32>
    %76 = arith.maximumf %71, %74 : vector<1x16xf32>
    %c15 = arith.constant 15 : index
    %77 = memref.load %arg1[%c15] : memref<64xi32, #tpu.memory_space<smem>>
    %78 = arith.index_cast %77 : i32 to index
    %c0_21 = arith.constant 0 : index
    %79 = vector.load %arg2[%78, %c0_21] : memref<64x16xf32, #tpu.memory_space<vmem>>, vector<1x16xf32>
    %80 = arith.addf %75, %79 : vector<1x16xf32>
    %81 = arith.maximumf %76, %79 : vector<1x16xf32>
    %cst_22 = arith.constant 1.250000e-01 : f32
    %82 = vector.broadcast %cst_22 : f32 to vector<1x16xf32>
    %83 = arith.mulf %80, %82 : vector<1x16xf32>
    %c0_23 = arith.constant 0 : index
    %c32 = arith.constant 32 : index
    %84 = vector.load %arg6[%c0_23, %c32] : memref<8x64xf32, #tpu.memory_space<vmem>>, vector<1x16xf32>
    tpu.vector_store %arg6[%c0_23, %c32], %83 {strides = array<i32>} : memref<8x64xf32, #tpu.memory_space<vmem>>, vector<1x16xf32>,
    %c0_24 = arith.constant 0 : index
    %c48 = arith.constant 48 : index
    %85 = vector.load %arg6[%c0_24, %c48] : memref<8x64xf32, #tpu.memory_space<vmem>>, vector<1x16xf32>
    tpu.vector_store %arg6[%c0_24, %c48], %81 {strides = array<i32>} : memref<8x64xf32, #tpu.memory_space<vmem>>, vector<1x16xf32>,
    %c16_25 = arith.constant 16 : index
    %86 = memref.load %arg1[%c16_25] : memref<64xi32, #tpu.memory_space<smem>>
    %87 = arith.index_cast %86 : i32 to index
    %c0_26 = arith.constant 0 : index
    %88 = vector.load %arg2[%87, %c0_26] : memref<64x16xf32, #tpu.memory_space<vmem>>, vector<1x16xf32>
    %c17 = arith.constant 17 : index
    %89 = memref.load %arg1[%c17] : memref<64xi32, #tpu.memory_space<smem>>
    %90 = arith.index_cast %89 : i32 to index
    %c0_27 = arith.constant 0 : index
    %91 = vector.load %arg2[%90, %c0_27] : memref<64x16xf32, #tpu.memory_space<vmem>>, vector<1x16xf32>
    %92 = arith.addf %88, %91 : vector<1x16xf32>
    %93 = arith.maximumf %88, %91 : vector<1x16xf32>
    %c18 = arith.constant 18 : index
    %94 = memref.load %arg1[%c18] : memref<64xi32, #tpu.memory_space<smem>>
    %95 = arith.index_cast %94 : i32 to index
    %c0_28 = arith.constant 0 : index
    %96 = vector.load %arg2[%95, %c0_28] : memref<64x16xf32, #tpu.memory_space<vmem>>, vector<1x16xf32>
    %97 = arith.addf %92, %96 : vector<1x16xf32>
    %98 = arith.maximumf %93, %96 : vector<1x16xf32>
    %c19 = arith.constant 19 : index
    %99 = memref.load %arg1[%c19] : memref<64xi32, #tpu.memory_space<smem>>
    %100 = arith.index_cast %99 : i32 to index
    %c0_29 = arith.constant 0 : index
    %101 = vector.load %arg2[%100, %c0_29] : memref<64x16xf32, #tpu.memory_space<vmem>>, vector<1x16xf32>
    %102 = arith.addf %97, %101 : vector<1x16xf32>
    %103 = arith.maximumf %98, %101 : vector<1x16xf32>
    %c20 = arith.constant 20 : index
    %104 = memref.load %arg1[%c20] : memref<64xi32, #tpu.memory_space<smem>>
    %105 = arith.index_cast %104 : i32 to index
    %c0_30 = arith.constant 0 : index
    %106 = vector.load %arg2[%105, %c0_30] : memref<64x16xf32, #tpu.memory_space<vmem>>, vector<1x16xf32>
    %107 = arith.addf %102, %106 : vector<1x16xf32>
    %108 = arith.maximumf %103, %106 : vector<1x16xf32>
    %c21 = arith.constant 21 : index
    %109 = memref.load %arg1[%c21] : memref<64xi32, #tpu.memory_space<smem>>
    %110 = arith.index_cast %109 : i32 to index
    %c0_31 = arith.constant 0 : index
    %111 = vector.load %arg2[%110, %c0_31] : memref<64x16xf32, #tpu.memory_space<vmem>>, vector<1x16xf32>
    %112 = arith.addf %107, %111 : vector<1x16xf32>
    %113 = arith.maximumf %108, %111 : vector<1x16xf32>
    %c22 = arith.constant 22 : index
    %114 = memref.load %arg1[%c22] : memref<64xi32, #tpu.memory_space<smem>>
    %115 = arith.index_cast %114 : i32 to index
    %c0_32 = arith.constant 0 : index
    %116 = vector.load %arg2[%115, %c0_32] : memref<64x16xf32, #tpu.memory_space<vmem>>, vector<1x16xf32>
    %117 = arith.addf %112, %116 : vector<1x16xf32>
    %118 = arith.maximumf %113, %116 : vector<1x16xf32>
    %c23 = arith.constant 23 : index
    %119 = memref.load %arg1[%c23] : memref<64xi32, #tpu.memory_space<smem>>
    %120 = arith.index_cast %119 : i32 to index
    %c0_33 = arith.constant 0 : index
    %121 = vector.load %arg2[%120, %c0_33] : memref<64x16xf32, #tpu.memory_space<vmem>>, vector<1x16xf32>
    %122 = arith.addf %117, %121 : vector<1x16xf32>
    %123 = arith.maximumf %118, %121 : vector<1x16xf32>
    %cst_34 = arith.constant 1.250000e-01 : f32
    %124 = vector.broadcast %cst_34 : f32 to vector<1x16xf32>
    %125 = arith.mulf %122, %124 : vector<1x16xf32>
    %c1_35 = arith.constant 1 : index
    %c0_36 = arith.constant 0 : index
    %126 = vector.load %arg6[%c1_35, %c0_36] : memref<8x64xf32, #tpu.memory_space<vmem>>, vector<1x16xf32>
    tpu.vector_store %arg6[%c1_35, %c0_36], %125 {strides = array<i32>} : memref<8x64xf32, #tpu.memory_space<vmem>>, vector<1x16xf32>,
    %c1_37 = arith.constant 1 : index
    %c16_38 = arith.constant 16 : index
    %127 = vector.load %arg6[%c1_37, %c16_38] : memref<8x64xf32, #tpu.memory_space<vmem>>, vector<1x16xf32>
    tpu.vector_store %arg6[%c1_37, %c16_38], %123 {strides = array<i32>} : memref<8x64xf32, #tpu.memory_space<vmem>>, vector<1x16xf32>,
    %c24 = arith.constant 24 : index
    %128 = memref.load %arg1[%c24] : memref<64xi32, #tpu.memory_space<smem>>
    %129 = arith.index_cast %128 : i32 to index
    %c0_39 = arith.constant 0 : index
    %130 = vector.load %arg2[%129, %c0_39] : memref<64x16xf32, #tpu.memory_space<vmem>>, vector<1x16xf32>
    %c25 = arith.constant 25 : index
    %131 = memref.load %arg1[%c25] : memref<64xi32, #tpu.memory_space<smem>>
    %132 = arith.index_cast %131 : i32 to index
    %c0_40 = arith.constant 0 : index
    %133 = vector.load %arg2[%132, %c0_40] : memref<64x16xf32, #tpu.memory_space<vmem>>, vector<1x16xf32>
    %134 = arith.addf %130, %133 : vector<1x16xf32>
    %135 = arith.maximumf %130, %133 : vector<1x16xf32>
    %c26 = arith.constant 26 : index
    %136 = memref.load %arg1[%c26] : memref<64xi32, #tpu.memory_space<smem>>
    %137 = arith.index_cast %136 : i32 to index
    %c0_41 = arith.constant 0 : index
    %138 = vector.load %arg2[%137, %c0_41] : memref<64x16xf32, #tpu.memory_space<vmem>>, vector<1x16xf32>
    %139 = arith.addf %134, %138 : vector<1x16xf32>
    %140 = arith.maximumf %135, %138 : vector<1x16xf32>
    %c27 = arith.constant 27 : index
    %141 = memref.load %arg1[%c27] : memref<64xi32, #tpu.memory_space<smem>>
    %142 = arith.index_cast %141 : i32 to index
    %c0_42 = arith.constant 0 : index
    %143 = vector.load %arg2[%142, %c0_42] : memref<64x16xf32, #tpu.memory_space<vmem>>, vector<1x16xf32>
    %144 = arith.addf %139, %143 : vector<1x16xf32>
    %145 = arith.maximumf %140, %143 : vector<1x16xf32>
    %c28 = arith.constant 28 : index
    %146 = memref.load %arg1[%c28] : memref<64xi32, #tpu.memory_space<smem>>
    %147 = arith.index_cast %146 : i32 to index
    %c0_43 = arith.constant 0 : index
    %148 = vector.load %arg2[%147, %c0_43] : memref<64x16xf32, #tpu.memory_space<vmem>>, vector<1x16xf32>
    %149 = arith.addf %144, %148 : vector<1x16xf32>
    %150 = arith.maximumf %145, %148 : vector<1x16xf32>
    %c29 = arith.constant 29 : index
    %151 = memref.load %arg1[%c29] : memref<64xi32, #tpu.memory_space<smem>>
    %152 = arith.index_cast %151 : i32 to index
    %c0_44 = arith.constant 0 : index
    %153 = vector.load %arg2[%152, %c0_44] : memref<64x16xf32, #tpu.memory_space<vmem>>, vector<1x16xf32>
    %154 = arith.addf %149, %153 : vector<1x16xf32>
    %155 = arith.maximumf %150, %153 : vector<1x16xf32>
    %c30 = arith.constant 30 : index
    %156 = memref.load %arg1[%c30] : memref<64xi32, #tpu.memory_space<smem>>
    %157 = arith.index_cast %156 : i32 to index
    %c0_45 = arith.constant 0 : index
    %158 = vector.load %arg2[%157, %c0_45] : memref<64x16xf32, #tpu.memory_space<vmem>>, vector<1x16xf32>
    %159 = arith.addf %154, %158 : vector<1x16xf32>
    %160 = arith.maximumf %155, %158 : vector<1x16xf32>
    %c31 = arith.constant 31 : index
    %161 = memref.load %arg1[%c31] : memref<64xi32, #tpu.memory_space<smem>>
    %162 = arith.index_cast %161 : i32 to index
    %c0_46 = arith.constant 0 : index
    %163 = vector.load %arg2[%162, %c0_46] : memref<64x16xf32, #tpu.memory_space<vmem>>, vector<1x16xf32>
    %164 = arith.addf %159, %163 : vector<1x16xf32>
    %165 = arith.maximumf %160, %163 : vector<1x16xf32>
    %cst_47 = arith.constant 1.250000e-01 : f32
    %166 = vector.broadcast %cst_47 : f32 to vector<1x16xf32>
    %167 = arith.mulf %164, %166 : vector<1x16xf32>
    %c1_48 = arith.constant 1 : index
    %c32_49 = arith.constant 32 : index
    %168 = vector.load %arg6[%c1_48, %c32_49] : memref<8x64xf32, #tpu.memory_space<vmem>>, vector<1x16xf32>
    tpu.vector_store %arg6[%c1_48, %c32_49], %167 {strides = array<i32>} : memref<8x64xf32, #tpu.memory_space<vmem>>, vector<1x16xf32>,
    %c1_50 = arith.constant 1 : index
    %c48_51 = arith.constant 48 : index
    %169 = vector.load %arg6[%c1_50, %c48_51] : memref<8x64xf32, #tpu.memory_space<vmem>>, vector<1x16xf32>
    tpu.vector_store %arg6[%c1_50, %c48_51], %165 {strides = array<i32>} : memref<8x64xf32, #tpu.memory_space<vmem>>, vector<1x16xf32>,
    %c32_52 = arith.constant 32 : index
    %170 = memref.load %arg1[%c32_52] : memref<64xi32, #tpu.memory_space<smem>>
    %171 = arith.index_cast %170 : i32 to index
    %c0_53 = arith.constant 0 : index
    %172 = vector.load %arg2[%171, %c0_53] : memref<64x16xf32, #tpu.memory_space<vmem>>, vector<1x16xf32>
    %c33 = arith.constant 33 : index
    %173 = memref.load %arg1[%c33] : memref<64xi32, #tpu.memory_space<smem>>
    %174 = arith.index_cast %173 : i32 to index
    %c0_54 = arith.constant 0 : index
    %175 = vector.load %arg2[%174, %c0_54] : memref<64x16xf32, #tpu.memory_space<vmem>>, vector<1x16xf32>
    %176 = arith.addf %172, %175 : vector<1x16xf32>
    %177 = arith.maximumf %172, %175 : vector<1x16xf32>
    %c34 = arith.constant 34 : index
    %178 = memref.load %arg1[%c34] : memref<64xi32, #tpu.memory_space<smem>>
    %179 = arith.index_cast %178 : i32 to index
    %c0_55 = arith.constant 0 : index
    %180 = vector.load %arg2[%179, %c0_55] : memref<64x16xf32, #tpu.memory_space<vmem>>, vector<1x16xf32>
    %181 = arith.addf %176, %180 : vector<1x16xf32>
    %182 = arith.maximumf %177, %180 : vector<1x16xf32>
    %c35 = arith.constant 35 : index
    %183 = memref.load %arg1[%c35] : memref<64xi32, #tpu.memory_space<smem>>
    %184 = arith.index_cast %183 : i32 to index
    %c0_56 = arith.constant 0 : index
    %185 = vector.load %arg2[%184, %c0_56] : memref<64x16xf32, #tpu.memory_space<vmem>>, vector<1x16xf32>
    %186 = arith.addf %181, %185 : vector<1x16xf32>
    %187 = arith.maximumf %182, %185 : vector<1x16xf32>
    %c36 = arith.constant 36 : index
    %188 = memref.load %arg1[%c36] : memref<64xi32, #tpu.memory_space<smem>>
    %189 = arith.index_cast %188 : i32 to index
    %c0_57 = arith.constant 0 : index
    %190 = vector.load %arg2[%189, %c0_57] : memref<64x16xf32, #tpu.memory_space<vmem>>, vector<1x16xf32>
    %191 = arith.addf %186, %190 : vector<1x16xf32>
    %192 = arith.maximumf %187, %190 : vector<1x16xf32>
    %c37 = arith.constant 37 : index
    %193 = memref.load %arg1[%c37] : memref<64xi32, #tpu.memory_space<smem>>
    %194 = arith.index_cast %193 : i32 to index
    %c0_58 = arith.constant 0 : index
    %195 = vector.load %arg2[%194, %c0_58] : memref<64x16xf32, #tpu.memory_space<vmem>>, vector<1x16xf32>
    %196 = arith.addf %191, %195 : vector<1x16xf32>
    %197 = arith.maximumf %192, %195 : vector<1x16xf32>
    %c38 = arith.constant 38 : index
    %198 = memref.load %arg1[%c38] : memref<64xi32, #tpu.memory_space<smem>>
    %199 = arith.index_cast %198 : i32 to index
    %c0_59 = arith.constant 0 : index
    %200 = vector.load %arg2[%199, %c0_59] : memref<64x16xf32, #tpu.memory_space<vmem>>, vector<1x16xf32>
    %201 = arith.addf %196, %200 : vector<1x16xf32>
    %202 = arith.maximumf %197, %200 : vector<1x16xf32>
    %c39 = arith.constant 39 : index
    %203 = memref.load %arg1[%c39] : memref<64xi32, #tpu.memory_space<smem>>
    %204 = arith.index_cast %203 : i32 to index
    %c0_60 = arith.constant 0 : index
    %205 = vector.load %arg2[%204, %c0_60] : memref<64x16xf32, #tpu.memory_space<vmem>>, vector<1x16xf32>
    %206 = arith.addf %201, %205 : vector<1x16xf32>
    %207 = arith.maximumf %202, %205 : vector<1x16xf32>
    %cst_61 = arith.constant 1.250000e-01 : f32
    %208 = vector.broadcast %cst_61 : f32 to vector<1x16xf32>
    %209 = arith.mulf %206, %208 : vector<1x16xf32>
    %c2_62 = arith.constant 2 : index
    %c0_63 = arith.constant 0 : index
    %210 = vector.load %arg6[%c2_62, %c0_63] : memref<8x64xf32, #tpu.memory_space<vmem>>, vector<1x16xf32>
    tpu.vector_store %arg6[%c2_62, %c0_63], %209 {strides = array<i32>} : memref<8x64xf32, #tpu.memory_space<vmem>>, vector<1x16xf32>,
    %c2_64 = arith.constant 2 : index
    %c16_65 = arith.constant 16 : index
    %211 = vector.load %arg6[%c2_64, %c16_65] : memref<8x64xf32, #tpu.memory_space<vmem>>, vector<1x16xf32>
    tpu.vector_store %arg6[%c2_64, %c16_65], %207 {strides = array<i32>} : memref<8x64xf32, #tpu.memory_space<vmem>>, vector<1x16xf32>,
    %c40 = arith.constant 40 : index
    %212 = memref.load %arg1[%c40] : memref<64xi32, #tpu.memory_space<smem>>
    %213 = arith.index_cast %212 : i32 to index
    %c0_66 = arith.constant 0 : index
    %214 = vector.load %arg2[%213, %c0_66] : memref<64x16xf32, #tpu.memory_space<vmem>>, vector<1x16xf32>
    %c41 = arith.constant 41 : index
    %215 = memref.load %arg1[%c41] : memref<64xi32, #tpu.memory_space<smem>>
    %216 = arith.index_cast %215 : i32 to index
    %c0_67 = arith.constant 0 : index
    %217 = vector.load %arg2[%216, %c0_67] : memref<64x16xf32, #tpu.memory_space<vmem>>, vector<1x16xf32>
    %218 = arith.addf %214, %217 : vector<1x16xf32>
    %219 = arith.maximumf %214, %217 : vector<1x16xf32>
    %c42 = arith.constant 42 : index
    %220 = memref.load %arg1[%c42] : memref<64xi32, #tpu.memory_space<smem>>
    %221 = arith.index_cast %220 : i32 to index
    %c0_68 = arith.constant 0 : index
    %222 = vector.load %arg2[%221, %c0_68] : memref<64x16xf32, #tpu.memory_space<vmem>>, vector<1x16xf32>
    %223 = arith.addf %218, %222 : vector<1x16xf32>
    %224 = arith.maximumf %219, %222 : vector<1x16xf32>
    %c43 = arith.constant 43 : index
    %225 = memref.load %arg1[%c43] : memref<64xi32, #tpu.memory_space<smem>>
    %226 = arith.index_cast %225 : i32 to index
    %c0_69 = arith.constant 0 : index
    %227 = vector.load %arg2[%226, %c0_69] : memref<64x16xf32, #tpu.memory_space<vmem>>, vector<1x16xf32>
    %228 = arith.addf %223, %227 : vector<1x16xf32>
    %229 = arith.maximumf %224, %227 : vector<1x16xf32>
    %c44 = arith.constant 44 : index
    %230 = memref.load %arg1[%c44] : memref<64xi32, #tpu.memory_space<smem>>
    %231 = arith.index_cast %230 : i32 to index
    %c0_70 = arith.constant 0 : index
    %232 = vector.load %arg2[%231, %c0_70] : memref<64x16xf32, #tpu.memory_space<vmem>>, vector<1x16xf32>
    %233 = arith.addf %228, %232 : vector<1x16xf32>
    %234 = arith.maximumf %229, %232 : vector<1x16xf32>
    %c45 = arith.constant 45 : index
    %235 = memref.load %arg1[%c45] : memref<64xi32, #tpu.memory_space<smem>>
    %236 = arith.index_cast %235 : i32 to index
    %c0_71 = arith.constant 0 : index
    %237 = vector.load %arg2[%236, %c0_71] : memref<64x16xf32, #tpu.memory_space<vmem>>, vector<1x16xf32>
    %238 = arith.addf %233, %237 : vector<1x16xf32>
    %239 = arith.maximumf %234, %237 : vector<1x16xf32>
    %c46 = arith.constant 46 : index
    %240 = memref.load %arg1[%c46] : memref<64xi32, #tpu.memory_space<smem>>
    %241 = arith.index_cast %240 : i32 to index
    %c0_72 = arith.constant 0 : index
    %242 = vector.load %arg2[%241, %c0_72] : memref<64x16xf32, #tpu.memory_space<vmem>>, vector<1x16xf32>
    %243 = arith.addf %238, %242 : vector<1x16xf32>
    %244 = arith.maximumf %239, %242 : vector<1x16xf32>
    %c47 = arith.constant 47 : index
    %245 = memref.load %arg1[%c47] : memref<64xi32, #tpu.memory_space<smem>>
    %246 = arith.index_cast %245 : i32 to index
    %c0_73 = arith.constant 0 : index
    %247 = vector.load %arg2[%246, %c0_73] : memref<64x16xf32, #tpu.memory_space<vmem>>, vector<1x16xf32>
    %248 = arith.addf %243, %247 : vector<1x16xf32>
    %249 = arith.maximumf %244, %247 : vector<1x16xf32>
    %cst_74 = arith.constant 1.250000e-01 : f32
    %250 = vector.broadcast %cst_74 : f32 to vector<1x16xf32>
    %251 = arith.mulf %248, %250 : vector<1x16xf32>
    %c2_75 = arith.constant 2 : index
    %c32_76 = arith.constant 32 : index
    %252 = vector.load %arg6[%c2_75, %c32_76] : memref<8x64xf32, #tpu.memory_space<vmem>>, vector<1x16xf32>
    tpu.vector_store %arg6[%c2_75, %c32_76], %251 {strides = array<i32>} : memref<8x64xf32, #tpu.memory_space<vmem>>, vector<1x16xf32>,
    %c2_77 = arith.constant 2 : index
    %c48_78 = arith.constant 48 : index
    %253 = vector.load %arg6[%c2_77, %c48_78] : memref<8x64xf32, #tpu.memory_space<vmem>>, vector<1x16xf32>
    tpu.vector_store %arg6[%c2_77, %c48_78], %249 {strides = array<i32>} : memref<8x64xf32, #tpu.memory_space<vmem>>, vector<1x16xf32>,
    %c48_79 = arith.constant 48 : index
    %254 = memref.load %arg1[%c48_79] : memref<64xi32, #tpu.memory_space<smem>>
    %255 = arith.index_cast %254 : i32 to index
    %c0_80 = arith.constant 0 : index
    %256 = vector.load %arg2[%255, %c0_80] : memref<64x16xf32, #tpu.memory_space<vmem>>, vector<1x16xf32>
    %c49 = arith.constant 49 : index
    %257 = memref.load %arg1[%c49] : memref<64xi32, #tpu.memory_space<smem>>
    %258 = arith.index_cast %257 : i32 to index
    %c0_81 = arith.constant 0 : index
    %259 = vector.load %arg2[%258, %c0_81] : memref<64x16xf32, #tpu.memory_space<vmem>>, vector<1x16xf32>
    %260 = arith.addf %256, %259 : vector<1x16xf32>
    %261 = arith.maximumf %256, %259 : vector<1x16xf32>
    %c50 = arith.constant 50 : index
    %262 = memref.load %arg1[%c50] : memref<64xi32, #tpu.memory_space<smem>>
    %263 = arith.index_cast %262 : i32 to index
    %c0_82 = arith.constant 0 : index
    %264 = vector.load %arg2[%263, %c0_82] : memref<64x16xf32, #tpu.memory_space<vmem>>, vector<1x16xf32>
    %265 = arith.addf %260, %264 : vector<1x16xf32>
    %266 = arith.maximumf %261, %264 : vector<1x16xf32>
    %c51 = arith.constant 51 : index
    %267 = memref.load %arg1[%c51] : memref<64xi32, #tpu.memory_space<smem>>
    %268 = arith.index_cast %267 : i32 to index
    %c0_83 = arith.constant 0 : index
    %269 = vector.load %arg2[%268, %c0_83] : memref<64x16xf32, #tpu.memory_space<vmem>>, vector<1x16xf32>
    %270 = arith.addf %265, %269 : vector<1x16xf32>
    %271 = arith.maximumf %266, %269 : vector<1x16xf32>
    %c52 = arith.constant 52 : index
    %272 = memref.load %arg1[%c52] : memref<64xi32, #tpu.memory_space<smem>>
    %273 = arith.index_cast %272 : i32 to index
    %c0_84 = arith.constant 0 : index
    %274 = vector.load %arg2[%273, %c0_84] : memref<64x16xf32, #tpu.memory_space<vmem>>, vector<1x16xf32>
    %275 = arith.addf %270, %274 : vector<1x16xf32>
    %276 = arith.maximumf %271, %274 : vector<1x16xf32>
    %c53 = arith.constant 53 : index
    %277 = memref.load %arg1[%c53] : memref<64xi32, #tpu.memory_space<smem>>
    %278 = arith.index_cast %277 : i32 to index
    %c0_85 = arith.constant 0 : index
    %279 = vector.load %arg2[%278, %c0_85] : memref<64x16xf32, #tpu.memory_space<vmem>>, vector<1x16xf32>
    %280 = arith.addf %275, %279 : vector<1x16xf32>
    %281 = arith.maximumf %276, %279 : vector<1x16xf32>
    %c54 = arith.constant 54 : index
    %282 = memref.load %arg1[%c54] : memref<64xi32, #tpu.memory_space<smem>>
    %283 = arith.index_cast %282 : i32 to index
    %c0_86 = arith.constant 0 : index
    %284 = vector.load %arg2[%283, %c0_86] : memref<64x16xf32, #tpu.memory_space<vmem>>, vector<1x16xf32>
    %285 = arith.addf %280, %284 : vector<1x16xf32>
    %286 = arith.maximumf %281, %284 : vector<1x16xf32>
    %c55 = arith.constant 55 : index
    %287 = memref.load %arg1[%c55] : memref<64xi32, #tpu.memory_space<smem>>
    %288 = arith.index_cast %287 : i32 to index
    %c0_87 = arith.constant 0 : index
    %289 = vector.load %arg2[%288, %c0_87] : memref<64x16xf32, #tpu.memory_space<vmem>>, vector<1x16xf32>
    %290 = arith.addf %285, %289 : vector<1x16xf32>
    %291 = arith.maximumf %286, %289 : vector<1x16xf32>
    %cst_88 = arith.constant 1.250000e-01 : f32
    %292 = vector.broadcast %cst_88 : f32 to vector<1x16xf32>
    %293 = arith.mulf %290, %292 : vector<1x16xf32>
    %c3_89 = arith.constant 3 : index
    %c0_90 = arith.constant 0 : index
    %294 = vector.load %arg6[%c3_89, %c0_90] : memref<8x64xf32, #tpu.memory_space<vmem>>, vector<1x16xf32>
    tpu.vector_store %arg6[%c3_89, %c0_90], %293 {strides = array<i32>} : memref<8x64xf32, #tpu.memory_space<vmem>>, vector<1x16xf32>,
    %c3_91 = arith.constant 3 : index
    %c16_92 = arith.constant 16 : index
    %295 = vector.load %arg6[%c3_91, %c16_92] : memref<8x64xf32, #tpu.memory_space<vmem>>, vector<1x16xf32>
    tpu.vector_store %arg6[%c3_91, %c16_92], %291 {strides = array<i32>} : memref<8x64xf32, #tpu.memory_space<vmem>>, vector<1x16xf32>,
    %c56 = arith.constant 56 : index
    %296 = memref.load %arg1[%c56] : memref<64xi32, #tpu.memory_space<smem>>
    %297 = arith.index_cast %296 : i32 to index
    %c0_93 = arith.constant 0 : index
    %298 = vector.load %arg2[%297, %c0_93] : memref<64x16xf32, #tpu.memory_space<vmem>>, vector<1x16xf32>
    %c57 = arith.constant 57 : index
    %299 = memref.load %arg1[%c57] : memref<64xi32, #tpu.memory_space<smem>>
    %300 = arith.index_cast %299 : i32 to index
    %c0_94 = arith.constant 0 : index
    %301 = vector.load %arg2[%300, %c0_94] : memref<64x16xf32, #tpu.memory_space<vmem>>, vector<1x16xf32>
    %302 = arith.addf %298, %301 : vector<1x16xf32>
    %303 = arith.maximumf %298, %301 : vector<1x16xf32>
    %c58 = arith.constant 58 : index
    %304 = memref.load %arg1[%c58] : memref<64xi32, #tpu.memory_space<smem>>
    %305 = arith.index_cast %304 : i32 to index
    %c0_95 = arith.constant 0 : index
    %306 = vector.load %arg2[%305, %c0_95] : memref<64x16xf32, #tpu.memory_space<vmem>>, vector<1x16xf32>
    %307 = arith.addf %302, %306 : vector<1x16xf32>
    %308 = arith.maximumf %303, %306 : vector<1x16xf32>
    %c59 = arith.constant 59 : index
    %309 = memref.load %arg1[%c59] : memref<64xi32, #tpu.memory_space<smem>>
    %310 = arith.index_cast %309 : i32 to index
    %c0_96 = arith.constant 0 : index
    %311 = vector.load %arg2[%310, %c0_96] : memref<64x16xf32, #tpu.memory_space<vmem>>, vector<1x16xf32>
    %312 = arith.addf %307, %311 : vector<1x16xf32>
    %313 = arith.maximumf %308, %311 : vector<1x16xf32>
    %c60 = arith.constant 60 : index
    %314 = memref.load %arg1[%c60] : memref<64xi32, #tpu.memory_space<smem>>
    %315 = arith.index_cast %314 : i32 to index
    %c0_97 = arith.constant 0 : index
    %316 = vector.load %arg2[%315, %c0_97] : memref<64x16xf32, #tpu.memory_space<vmem>>, vector<1x16xf32>
    %317 = arith.addf %312, %316 : vector<1x16xf32>
    %318 = arith.maximumf %313, %316 : vector<1x16xf32>
    %c61 = arith.constant 61 : index
    %319 = memref.load %arg1[%c61] : memref<64xi32, #tpu.memory_space<smem>>
    %320 = arith.index_cast %319 : i32 to index
    %c0_98 = arith.constant 0 : index
    %321 = vector.load %arg2[%320, %c0_98] : memref<64x16xf32, #tpu.memory_space<vmem>>, vector<1x16xf32>
    %322 = arith.addf %317, %321 : vector<1x16xf32>
    %323 = arith.maximumf %318, %321 : vector<1x16xf32>
    %c62 = arith.constant 62 : index
    %324 = memref.load %arg1[%c62] : memref<64xi32, #tpu.memory_space<smem>>
    %325 = arith.index_cast %324 : i32 to index
    %c0_99 = arith.constant 0 : index
    %326 = vector.load %arg2[%325, %c0_99] : memref<64x16xf32, #tpu.memory_space<vmem>>, vector<1x16xf32>
    %327 = arith.addf %322, %326 : vector<1x16xf32>
    %328 = arith.maximumf %323, %326 : vector<1x16xf32>
    %c63 = arith.constant 63 : index
    %329 = memref.load %arg1[%c63] : memref<64xi32, #tpu.memory_space<smem>>
    %330 = arith.index_cast %329 : i32 to index
    %c0_100 = arith.constant 0 : index
    %331 = vector.load %arg2[%330, %c0_100] : memref<64x16xf32, #tpu.memory_space<vmem>>, vector<1x16xf32>
    %332 = arith.addf %327, %331 : vector<1x16xf32>
    %333 = arith.maximumf %328, %331 : vector<1x16xf32>
    %cst_101 = arith.constant 1.250000e-01 : f32
    %334 = vector.broadcast %cst_101 : f32 to vector<1x16xf32>
    %335 = arith.mulf %332, %334 : vector<1x16xf32>
    %c3_102 = arith.constant 3 : index
    %c32_103 = arith.constant 32 : index
    %336 = vector.load %arg6[%c3_102, %c32_103] : memref<8x64xf32, #tpu.memory_space<vmem>>, vector<1x16xf32>
    tpu.vector_store %arg6[%c3_102, %c32_103], %335 {strides = array<i32>} : memref<8x64xf32, #tpu.memory_space<vmem>>, vector<1x16xf32>,
    %c3_104 = arith.constant 3 : index
    %c48_105 = arith.constant 48 : index
    %337 = vector.load %arg6[%c3_104, %c48_105] : memref<8x64xf32, #tpu.memory_space<vmem>>, vector<1x16xf32>
    tpu.vector_store %arg6[%c3_104, %c48_105], %333 {strides = array<i32>} : memref<8x64xf32, #tpu.memory_space<vmem>>, vector<1x16xf32>,
    %c0_106 = arith.constant 0 : index
    %c0_107 = arith.constant 0 : index
    %338 = vector.load %arg6[%c0_106, %c0_107] : memref<8x64xf32, #tpu.memory_space<vmem>>, vector<8x64xf32>
    %339 = arith.truncf %338 : vector<8x64xf32> to vector<8x64xbf16>
    %c0_108 = arith.constant 0 : index
    %c0_109 = arith.constant 0 : index
    %340 = vector.load %arg3[%c0_108, %c0_109] : memref<64x16xbf16, #tpu.memory_space<vmem>>, vector<64x16xbf16>
    %cst_110 = arith.constant dense<0.000000e+00> : vector<8x16xf32>
    %341 = tpu.matmul %339, %340, %cst_110 {dimension_numbers = #tpu.dot_dimension_numbers<[1], [0], [0], [1], [0, 0, 1, 1], [], []>} : vector<8x64xbf16>, vector<64x16xbf16>, vector<8x16xf32> -> vector<8x16xf32>
    %c0_111 = arith.constant 0 : index
    %c0_112 = arith.constant 0 : index
    %342 = vector.load %arg4[%c0_111, %c0_112] : memref<1x16xf32, #tpu.memory_space<vmem>>, vector<1x16xf32>
    %343 = vector.broadcast %342 : vector<1x16xf32> to vector<8x16xf32>
    %344 = arith.addf %341, %343 : vector<8x16xf32>
    %c0_113 = arith.constant 0 : index
    %c0_114 = arith.constant 0 : index
    %345 = vector.load %arg5[%c0_113, %c0_114] : memref<8x16xf32, #tpu.memory_space<vmem>>, vector<8x16xf32>
    tpu.vector_store %arg5[%c0_113, %c0_114], %344 {strides = array<i32>} : memref<8x16xf32, #tpu.memory_space<vmem>>, vector<8x16xf32>,
    return
  }
  func.func @transform_0(%arg0: i32, %arg1: memref<64xi32, #tpu.memory_space<smem>>) -> (i32, i32) {
    %c0_i32 = arith.constant 0 : i32
    %c0_i32_0 = arith.constant 0 : i32
    %c0_i32_1 = arith.constant 0 : i32
    return %c0_i32, %c0_i32_0 : i32, i32
  }
  func.func @transform_1(%arg0: i32, %arg1: memref<64xi32, #tpu.memory_space<smem>>) -> (i32, i32) {
    %c0_i32 = arith.constant 0 : i32
    %c0_i32_0 = arith.constant 0 : i32
    %c0_i32_1 = arith.constant 0 : i32
    return %c0_i32, %c0_i32_0 : i32, i32
  }
  func.func @transform_2(%arg0: i32, %arg1: memref<64xi32, #tpu.memory_space<smem>>) -> (i32, i32) {
    %c0_i32 = arith.constant 0 : i32
    %c0_i32_0 = arith.constant 0 : i32
    %c0_i32_1 = arith.constant 0 : i32
    return %c0_i32, %c0_i32_0 : i32, i32
  }
  func.func @transform_3(%arg0: i32, %arg1: memref<64xi32, #tpu.memory_space<smem>>) -> (i32, i32) {
    %c0_i32 = arith.constant 0 : i32
    %c0_i32_0 = arith.constant 0 : i32
    %c0_i32_1 = arith.constant 0 : i32
    return %c0_i32, %c0_i32_0 : i32, i32
  }
}

</mosaic_0001>

<bundles_post_ra>
// kernel: tpu_custom_call.1
= control target key start
LH: loop header
LB: loop body
LE: loop exit
PB: predicated region body
PF: predicated region fallthrough
CT: control target
= control target key end

     0   :  { %s1184_s0 = inlined_call_operand.vmem [shape: s32[64], index: 0, kind: input, shape index: {}]   ;;  %s1185_s1 = inlined_call_operand.vmem [shape: f32[64,16], index: 1, kind: input, shape index: {}]   ;;  %s1186_s2 = inlined_call_operand.vmem [shape: bf16[64,16], index: 2, kind: input, shape index: {}]   ;;  %s1187_s3 = inlined_call_operand.vmem [shape: f32[1,16], index: 3, kind: input, shape index: {}]   ;;  %s1188_s4 = inlined_call_operand.hbm [shape: f32[8,16], index: 4, kind: output, shape index: {}]  }
   0x1   :  { %s9_s17 = sshll.u32 %s1184_s0, 4  ;;  %s10_s17 = int_to_ptr.vmem [resolvable:$true] %s9_s17 }
   0x2   :  { %s666_s18 = scalar_lea.vmem %s10_s17, 16  ;;  %p671_p1 = scmp.lt.s32.totalorder %s10_s17, %s10_s17 }
   0x3   :  { %p667_p0 = scmp.ne.s32.totalorder %s10_s17, %s666_s18  ;;  %p672_p2 = scmp.lt.s32.totalorder %s666_s18, %s666_s18 }
   0x5   :  { %p673_p3 = por %p672_p2, %p671_p1 }
   0x7   :  { %p674_p4 = pnand %p673_p3, %p667_p0 }
   0x9   :  { %677 = shalt.err (!%p674_p4)  }
   0xa   :  { %s704_s19 = smov [#allocation4]  }
   0xb   :  { %12 = dma.vmem_to_smem %s10_s17, 16, %s704_s19, [#allocation3] }
   0xc   :  { %700 = dma.done.wait [#allocation3], 16 }
   0xd   :  { %701 = vsyncadd [#allocation3], 4294967280 }
   0xe   :  { %14 = sfence }
   0xf   :  { %s600_s20 = sld [smem:[#allocation4 + $0x20]]  ;;  %s601_s21 = sld [smem:[#allocation4 + $0x21]] }
  0x10   :  { %s602_s22 = sld [smem:[#allocation4 + $0x22]]  ;;  %s603_s23 = sld [smem:[#allocation4 + $0x23]] }
  0x11   :  { %s739_s24 = sld [smem:[#allocation4 + $0x24]]  ;;  %s741_s0 = sld [smem:[#allocation4 + $0x25]] }
  0x12   :  { %s743_s25 = sld [smem:[#allocation4 + $0x26]]  ;;  %s745_s26 = sld [smem:[#allocation4 + $0x27]] }
  0x13   :  { %s25_s27 = sld [smem:[#allocation4]]  ;;  %s747_s28 = sld [smem:[#allocation4 + $0x1]] }
  0x14   :  { %s749_s29 = sld [smem:[#allocation4 + $0x2]]  ;;  %s754_s7 = sld [smem:[#allocation4 + $0x3]] }
  0x15   :  { %s218_s6 = scalar_lea.vmem %s1185_s1, %s600_s20  ;;  %s221_s10 = scalar_lea.vmem %s1185_s1, %s601_s21 }
  0x16   :  { %v219_v0 = vld [vmem:[%s218_s6] sm:$0x1]  ;;  %s226_s13 = scalar_lea.vmem %s1185_s1, %s602_s22 }
  0x17   :  { %15 = vsyncpa [#allocation6], 0  ;;  %v222_v1 = vld [vmem:[%s221_s10] sm:$0x1]  ;;  %s231_s16 = scalar_lea.vmem %s1185_s1, %s603_s23  ;;  %s236_s19 = scalar_lea.vmem %s1185_s1, %s739_s24  ;;  %vm23_vm0 = vcmask 523264   ;;  %v705_v6 = vmov 0.0  }
  0x18   :  { %v227_v2 = vld [vmem:[%s226_s13] sm:$0x1]  ;;  %v223_v3 = vadd.f32 %v222_v1, %v219_v0  ;;  %v224_v4 = vmax.f32 %v219_v0, %v222_v1  ;;  %s241_s22 = scalar_lea.vmem %s1185_s1, %s741_s0  ;;  %s246_s6 = scalar_lea.vmem %s1185_s1, %s743_s25  ;;  %24 = vst.msk [vmem:[#allocation2] sm:$0xff] %vm23_vm0, %v705_v6  ;;  %643 = vmatprep.subr.bf16.mxu0 %v705_v6  ;;  %vm64_vm1 = vcmask 122880   ;;  %vm709_vm2 = vmmov 0  }
  0x19   :  { %v232_v5 = vld [vmem:[%s231_s16] sm:$0x1]  ;;  %s251_s9 = scalar_lea.vmem %s1185_s1, %s745_s26  ;;  %s26_s11 = scalar_lea.vmem %s1185_s1, %s25_s27  ;;  %651 = vmatprep.mubr.msk.bf16.mxu0 %vm709_vm2, %v705_v6  ;;  %vm70_vm3 = vcmask 254080   ;;  %vm115_vm4 = vcmask 385280   ;;  %vm121_vm5 = vcmask 516480   ;;  %vm489_vm6 = vcmask 130048  }
  0x1a   :  { %v228_v7 = vadd.f32 %v227_v2, %v223_v3  ;;  %v229_v8 = vmax.f32 %v224_v4, %v227_v2  ;;  %v237_v9 = vld [vmem:[%s236_s19] sm:$0x1]  ;;  %s29_s13 = scalar_lea.vmem %s1185_s1, %s747_s28  ;;  %s34_s16 = scalar_lea.vmem %s1185_s1, %s749_s29 }
  0x1b   :  { %v27_v10 = vld [vmem:[%s26_s11] sm:$0x1]  ;;  %s39_s18 = scalar_lea.vmem %s1185_s1, %s754_s7  ;;  %s799_s20 = sld [smem:[#allocation4 + $0x4]] }
  0x1c   :  { %v30_v11 = vld [vmem:[%s29_s13] sm:$0x1]  ;;  %v233_v13 = vadd.f32 %v232_v5, %v228_v7  ;;  %v234_v14 = vmax.f32 %v229_v8, %v232_v5  ;;  %s801_s19 = sld [smem:[#allocation4 + $0x5]]  ;;  %s803_s28 = sld [smem:[#allocation4 + $0x6]] }
  0x1d   :  { %v35_v12 = vld [vmem:[%s34_s16] sm:$0x1]  ;;  %v32_v16 = vmax.f32 %v27_v10, %v30_v11  ;;  %v31_v17 = vadd.f32 %v30_v11, %v27_v10  ;;  %s805_s29 = sld [smem:[#allocation4 + $0x7]]  ;;  %s807_s21 = sld [smem:[#allocation4 + $0x30]] }
  0x1e   :  { %v242_v15 = vld [vmem:[%s241_s22] sm:$0x1]  ;;  %v238_v19 = vadd.f32 %v237_v9, %v233_v13  ;;  %v239_v20 = vmax.f32 %v234_v14, %v237_v9  ;;  %s809_s7 = sld [smem:[#allocation4 + $0x31]]  ;;  %s811_s22 = sld [smem:[#allocation4 + $0x32]] }
  0x1f   :  { %v40_v18 = vld [vmem:[%s39_s18] sm:$0x1]  ;;  %v37_v21 = vmax.f32 %v32_v16, %v35_v12  ;;  %v36_v22 = vadd.f32 %v35_v12, %v31_v17  ;;  %s818_s23 = sld [smem:[#allocation4 + $0x33]]  ;;  %s820_s8 = sld [smem:[#allocation4 + $0x34]] }
  0x20   :  { %v247_v23 = vld [vmem:[%s246_s6] sm:$0x1]  ;;  %v243_v24 = vadd.f32 %v242_v15, %v238_v19  ;;  %v244_v25 = vmax.f32 %v239_v20, %v242_v15  ;;  %s822_s24 = sld [smem:[#allocation4 + $0x35]]  ;;  %s824_s10 = sld [smem:[#allocation4 + $0x36]] }
  0x21   :  { %v42_v26 = vmax.f32 %v37_v21, %v40_v18  ;;  %v41_v27 = vadd.f32 %v40_v18, %v36_v22  ;;  %v252_v28 = vld [vmem:[%s251_s9] sm:$0x1]  ;;  %s44_s12 = scalar_lea.vmem %s1185_s1, %s799_s20  ;;  %s835_s13 = sld [smem:[#allocation4 + $0x37]] }
  0x22   :  { %v248_v29 = vadd.f32 %v247_v23, %v243_v24  ;;  %v249_v30 = vmax.f32 %v244_v25, %v247_v23  ;;  %v45_v31 = vld [vmem:[%s44_s12] sm:$0x1]  ;;  %s49_s16 = scalar_lea.vmem %s1185_s1, %s801_s19  ;;  %s54_s26 = scalar_lea.vmem %s1185_s1, %s803_s28 }
  0x23   :  { %v47_v32 = vmax.f32 %v42_v26, %v45_v31  ;;  %v50_v33 = vld [vmem:[%s49_s16] sm:$0x1]  ;;  %s59_s20 = scalar_lea.vmem %s1185_s1, %s805_s29  ;;  %v46_v34 = vadd.f32 %v45_v31, %v41_v27  ;;  %s312_s11 = scalar_lea.vmem %s1185_s1, %s807_s21 }
  0x24   :  { %v253_v35 = vadd.f32 %v252_v28, %v248_v29  ;;  %v254_v36 = vmax.f32 %v249_v30, %v252_v28  ;;  %v55_v37 = vld [vmem:[%s54_s26] sm:$0x1]  ;;  %s315_s28 = scalar_lea.vmem %s1185_s1, %s809_s7  ;;  %s320_s12 = scalar_lea.vmem %s1185_s1, %s811_s22 }
  0x25   :  { %v313_v38 = vld [vmem:[%s312_s11] sm:$0x1]  ;;  %v52_v39 = vmax.f32 %v47_v32, %v50_v33  ;;  %v51_v40 = vadd.f32 %v50_v33, %v46_v34  ;;  %s325_s14 = scalar_lea.vmem %s1185_s1, %s818_s23  ;;  %s330_s27 = scalar_lea.vmem %s1185_s1, %s820_s8 }
  0x26   :  { %v316_v41 = vld [vmem:[%s315_s28] sm:$0x1]  ;;  %v255_v43 = vmul.f32 0.125, %v253_v35  ;;  %s706_s7 = smov 16   ;;  %s335_s26 = scalar_lea.vmem %s1185_s1, %s822_s24 }
  0x27   :  { %v321_v42 = vld [vmem:[%s320_s12] sm:$0x1]  ;;  %258 = vrot.lane.b32.xlu1 %v254_v36, %s706_s7  ;;  %v317_v45 = vadd.f32 %v316_v41, %v313_v38  ;;  %v318_v46 = vmax.f32 %v313_v38, %v316_v41  ;;  %s340_s23 = scalar_lea.vmem %s1185_s1, %s824_s10  ;;  %v57_v47 = vmax.f32 %v52_v39, %v55_v37  ;;  %v56_v48 = vadd.f32 %v55_v37, %v51_v40  ;;  %s345_s5 = scalar_lea.vmem %s1185_s1, %s835_s13 }
  0x28   :  { %v60_v44 = vld [vmem:[%s59_s20] sm:$0x1]  ;;  %s882_s11 = sld [smem:[#allocation4 + $0x10]]  ;;  %s884_s20 = sld [smem:[#allocation4 + $0x11]]  ;;  %256 = vst.msk [vmem:[#allocation2 + $0x2] sm:$0x1] %vm64_vm1, %v255_v43 }
  0x29   :  { %v326_v49 = vld [vmem:[%s325_s14] sm:$0x1]  ;;  %v322_v50 = vadd.f32 %v321_v42, %v317_v45  ;;  %v323_v51 = vmax.f32 %v318_v46, %v321_v42  ;;  %s886_s19 = sld [smem:[#allocation4 + $0x12]]  ;;  %v62_v52 = vmax.f32 %v57_v47, %v60_v44  ;;  %v61_v53 = vadd.f32 %v60_v44, %v56_v48  ;;  %s889_s24 = sld [smem:[#allocation4 + $0x13]] }
  0x2a   :  { %v331_v54 = vld [vmem:[%s330_s27] sm:$0x1]  ;;  %s891_s10 = sld [smem:[#allocation4 + $0x14]]  ;;  %s893_s0 = sld [smem:[#allocation4 + $0x15]] }
  0x2b   :  { %v327_v55 = vadd.f32 %v326_v49, %v322_v50  ;;  %v328_v56 = vmax.f32 %v323_v51, %v326_v49  ;;  %s895_s28 = sld [smem:[#allocation4 + $0x16]]  ;;  %67 = vrot.lane.b32.xlu0 %v62_v52, %s706_s7  ;;  %v63_v57 = vmul.f32 0.125, %v61_v53  ;;  %v336_v58 = vld [vmem:[%s335_s26] sm:$0x1]  ;;  %s898_s25 = sld [smem:[#allocation4 + $0x17]] }
  0x2c   :  { %s900_s6 = sld [smem:[#allocation4 + $0x18]]  ;;  %s902_s12 = sld [smem:[#allocation4 + $0x19]]  ;;  %v341_v61 = vld [vmem:[%s340_s23] sm:$0x1] }
  0x2d   :  { %v332_v59 = vadd.f32 %v331_v54, %v327_v55  ;;  %v333_v60 = vmax.f32 %v328_v56, %v331_v54  ;;  %s908_s15 = sld [smem:[#allocation4 + $0x1a]]  ;;  %65 = vst.msk [vmem:[#allocation2] sm:$0x1] %vm64_vm1, %v63_v57  ;;  %v346_v1 = vld [vmem:[%s345_s5] sm:$0x1]  ;;  %s958_s21 = sld [smem:[#allocation4 + $0x1c]] }
  0x2e   :  { %s124_s14 = scalar_lea.vmem %s1185_s1, %s882_s11  ;;  %s127_s22 = scalar_lea.vmem %s1185_s1, %s884_s20 }
  0x2f   :  { %v337_v62 = vadd.f32 %v336_v58, %v332_v59  ;;  %v338_v63 = vmax.f32 %v333_v60, %v336_v58  ;;  %v125_v0 = vld [vmem:[%s124_s14] sm:$0x1]  ;;  %s132_s9 = scalar_lea.vmem %s1185_s1, %s886_s19  ;;  %s137_s11 = scalar_lea.vmem %s1185_s1, %s889_s24 }
  0x30   :  { %v128_v2 = vld [vmem:[%s127_s22] sm:$0x1]  ;;  %s142_s20 = scalar_lea.vmem %s1185_s1, %s891_s10  ;;  %s147_s5 = scalar_lea.vmem %s1185_s1, %s893_s0 }
  0x31   :  { %v133_v3 = vld [vmem:[%s132_s9] sm:$0x1]  ;;  %v342_v4 = vadd.f32 %v341_v61, %v337_v62  ;;  %v343_v5 = vmax.f32 %v338_v63, %v341_v61  ;;  %v129_v7 = vadd.f32 %v128_v2, %v125_v0  ;;  %v130_v8 = vmax.f32 %v125_v0, %v128_v2  ;;  %s152_s27 = scalar_lea.vmem %s1185_s1, %s895_s28  ;;  %s157_s17 = scalar_lea.vmem %s1185_s1, %s898_s25 }
  0x32   :  { %v138_v9 = vld [vmem:[%s137_s11] sm:$0x1]  ;;  %s944_s10 = sld [smem:[#allocation4 + $0x1b]]  ;;  %s169_s0 = scalar_lea.vmem %s1185_s1, %s900_s6 }
  0x33   :  { %v347_v10 = vadd.f32 %v346_v1, %v342_v4  ;;  %v348_v11 = vmax.f32 %v343_v5, %v346_v1  ;;  %v134_v12 = vadd.f32 %v133_v3, %v129_v7  ;;  %v135_v13 = vmax.f32 %v130_v8, %v133_v3  ;;  %v143_v14 = vld [vmem:[%s142_s20] sm:$0x1]  ;;  %s172_s8 = scalar_lea.vmem %s1185_s1, %s902_s12  ;;  %s177_s29 = scalar_lea.vmem %s1185_s1, %s908_s15 }
  0x34   :  { %v170_v15 = vld [vmem:[%s169_s0] sm:$0x1]  ;;  %s961_s6 = sld [smem:[#allocation4 + $0x1d]]  ;;  %s963_s12 = sld [smem:[#allocation4 + $0x1e]] }
  0x35   :  { %v173_v16 = vld [vmem:[%s172_s8] sm:$0x1]  ;;  %v349_v17 = vmul.f32 0.125, %v347_v10  ;;  %352 = vrot.lane.b32.xlu1 %v348_v11, %s706_s7  ;;  %v139_v18 = vadd.f32 %v138_v9, %v134_v12  ;;  %v140_v19 = vmax.f32 %v135_v13, %v138_v9  ;;  %s965_s20 = sld [smem:[#allocation4 + $0x1f]]  ;;  %s967_s15 = sld [smem:[#allocation4 + $0x8]] }
  0x36   :  { %v175_v20 = vmax.f32 %v170_v15, %v173_v16  ;;  %v178_v21 = vld [vmem:[%s177_s29] sm:$0x1]  ;;  %v174_v23 = vadd.f32 %v173_v16, %v170_v15  ;;  %s969_s19 = sld [smem:[#allocation4 + $0x9]]  ;;  %s981_s22 = sld [smem:[#allocation4 + $0xa]] }
  0x37   :  { %v148_v22 = vld [vmem:[%s147_s5] sm:$0x1]  ;;  %v144_v24 = vadd.f32 %v143_v14, %v139_v18  ;;  %v145_v25 = vmax.f32 %v140_v19, %v143_v14  ;;  %350 = vst.msk [vmem:[#allocation2 + $0x3] sm:$0x1] %vm64_vm1, %v349_v17  ;;  %s983_s26 = sld [smem:[#allocation4 + $0xb]]  ;;  %s985_s9 = sld [smem:[#allocation4 + $0xc]] }
  0x38   :  { %v180_v26 = vmax.f32 %v175_v20, %v178_v21  ;;  %v153_v27 = vld [vmem:[%s152_s27] sm:$0x1]  ;;  %s182_s24 = scalar_lea.vmem %s1185_s1, %s944_s10  ;;  %v179_v28 = vadd.f32 %v178_v21, %v174_v23  ;;  %s187_s18 = scalar_lea.vmem %s1185_s1, %s958_s21 }
  0x39   :  { %v149_v29 = vadd.f32 %v148_v22, %v144_v24  ;;  %v150_v30 = vmax.f32 %v145_v25, %v148_v22  ;;  %v183_v31 = vld [vmem:[%s182_s24] sm:$0x1]  ;;  %s996_s23 = sld [smem:[#allocation4 + $0xd]]  ;;  %s1002_s25 = sld [smem:[#allocation4 + $0xe]] }
  0x3a   :  { %v158_v32 = vld [vmem:[%s157_s17] sm:$0x1]  ;;  %v185_v33 = vmax.f32 %v180_v26, %v183_v31  ;;  %v184_v34 = vadd.f32 %v183_v31, %v179_v28  ;;  %s192_s11 = scalar_lea.vmem %s1185_s1, %s961_s6  ;;  %s197_s21 = scalar_lea.vmem %s1185_s1, %s963_s12 }
  0x3b   :  { %v154_v35 = vadd.f32 %v153_v27, %v149_v29  ;;  %v155_v36 = vmax.f32 %v150_v30, %v153_v27  ;;  %v188_v37 = vld [vmem:[%s187_s18] sm:$0x1]  ;;  %s202_s5 = scalar_lea.vmem %s1185_s1, %s965_s20  ;;  %s73_s24 = scalar_lea.vmem %s1185_s1, %s967_s15 }
  0x3c   :  { %v190_v38 = vmax.f32 %v185_v33, %v188_v37  ;;  %v193_v39 = vld [vmem:[%s192_s11] sm:$0x1]  ;;  %v189_v40 = vadd.f32 %v188_v37, %v184_v34  ;;  %s76_s27 = scalar_lea.vmem %s1185_s1, %s969_s19  ;;  %s81_s10 = scalar_lea.vmem %s1185_s1, %s981_s22 }
  0x3d   :  { %v159_v41 = vadd.f32 %v158_v32, %v154_v35  ;;  %v160_v42 = vmax.f32 %v155_v36, %v158_v32  ;;  %v198_v43 = vld [vmem:[%s197_s21] sm:$0x1]  ;;  %s1024_s18 = sld [smem:[#allocation4 + $0xf]]  ;;  %s86_s8 = scalar_lea.vmem %s1185_s1, %s983_s26 }
  0x3e   :  { %v195_v44 = vmax.f32 %v190_v38, %v193_v39  ;;  %v74_v45 = vld [vmem:[%s73_s24] sm:$0x1]  ;;  %v194_v47 = vadd.f32 %v193_v39, %v189_v40  ;;  %s91_s17 = scalar_lea.vmem %s1185_s1, %s985_s9  ;;  %s1045_s26 = sld [smem:[#allocation4 + $0x39]] }
  0x3f   :  { %v77_v46 = vld [vmem:[%s76_s27] sm:$0x1]  ;;  %v161_v48 = vmul.f32 0.125, %v159_v41  ;;  %164 = vrot.lane.b32.xlu0 %v160_v42, %s706_s7  ;;  %s96_s21 = scalar_lea.vmem %s1185_s1, %s996_s23  ;;  %s1039_s7 = sld [smem:[#allocation4 + $0x38]]  ;;  %v663_v42 = vld [vmem:[%s1186_s2 + $0x8] sm:$0xff]  }
  0x40   :  { %v203_v49 = vld [vmem:[%s202_s5] sm:$0x1]  ;;  %v79_v50 = vmax.f32 %v74_v45, %v77_v46  ;;  %v78_v52 = vadd.f32 %v77_v46, %v74_v45  ;;  %v200_v53 = vmax.f32 %v195_v44, %v198_v43  ;;  %v199_v55 = vadd.f32 %v198_v43, %v194_v47  ;;  %s101_s5 = scalar_lea.vmem %s1185_s1, %s1002_s25  ;;  %s1048_s9 = sld [smem:[#allocation4 + $0x3a]] }
  0x41   :  { %v82_v51 = vld [vmem:[%s81_s10] sm:$0x1]  ;;  %162 = vst.msk [vmem:[#allocation2 + $0x1] sm:$0x1] %vm64_vm1, %v161_v48  ;;  %s1050_s23 = sld [smem:[#allocation4 + $0x3b]]  ;;  %s1052_s16 = sld [smem:[#allocation4 + $0x3c]] }
  0x42   :  { %v87_v54 = vld [vmem:[%s86_s8] sm:$0x1]  ;;  %v84_v56 = vmax.f32 %v79_v50, %v82_v51  ;;  %v83_v57 = vadd.f32 %v82_v51, %v78_v52  ;;  %v205_v58 = vmax.f32 %v200_v53, %v203_v49  ;;  %v204_v60 = vadd.f32 %v203_v49, %v199_v55  ;;  %s1054_s6 = sld [smem:[#allocation4 + $0x3d]]  ;;  %s707_s25 = smov 48   ;;  %v664_v51 = vld [vmem:[%s1186_s2 + $0x10] sm:$0xff]  }
  0x43   :  { %v92_v59 = vld [vmem:[%s91_s17] sm:$0x1]  ;;  %s106_s28 = scalar_lea.vmem %s1185_s1, %s1024_s18  ;;  %s1061_s27 = sld [smem:[#allocation4 + $0x3e]] }
  0x44   :  { %v89_v61 = vmax.f32 %v84_v56, %v87_v54  ;;  %v88_v62 = vadd.f32 %v87_v54, %v83_v57  ;;  %213 = vrot.lane.b32.xlu1 %v205_v58, %s707_s25  ;;  %v97_v63 = vld [vmem:[%s96_s21] sm:$0x1]  ;;  %v206_v0 = vmul.f32 0.125, %v204_v60  ;;  %s1063_s12 = sld [smem:[#allocation4 + $0x3f]]  ;;  %s1065_s20 = sld [smem:[#allocation4 + $0x28]]  ;;  %v665_v58 = vld [vmem:[%s1186_s2 + $0x18] sm:$0xff]  }
  0x45   :  { %v102_v3 = vld [vmem:[%s101_s5] sm:$0x1]  ;;  %s357_s19 = scalar_lea.vmem %s1185_s1, %s1039_s7  ;;  %s1071_s8 = sld [smem:[#allocation4 + $0x29]] }
  0x46   :  { %v94_v1 = vmax.f32 %v89_v61, %v92_v59  ;;  %v93_v2 = vadd.f32 %v92_v59, %v88_v62  ;;  %v358_v7 = vld [vmem:[%s357_s19] sm:$0x1]  ;;  %s360_s11 = scalar_lea.vmem %s1185_s1, %s1045_s26  ;;  %s1077_s17 = sld [smem:[#allocation4 + $0x2a]] }
  0x47   :  { %v107_v8 = vld [vmem:[%s106_s28] sm:$0x1]  ;;  %s708_s22 = smov 32   ;;  %s365_s7 = scalar_lea.vmem %s1185_s1, %s1048_s9 }
  0x48   :  { %v99_v4 = vmax.f32 %v94_v1, %v97_v63  ;;  %v98_v5 = vadd.f32 %v97_v63, %v93_v2  ;;  %208 = vrot.lane.b32.xlu1 %v206_v0, %s708_s22  ;;  %v361_v9 = vld [vmem:[%s360_s11] sm:$0x1]  ;;  %s370_s5 = scalar_lea.vmem %s1185_s1, %s1050_s23  ;;  %s375_s0 = scalar_lea.vmem %s1185_s1, %s1052_s16 }
  0x49   :  { %v362_v12 = vadd.f32 %v361_v9, %v358_v7  ;;  %v366_v13 = vld [vmem:[%s365_s7] sm:$0x1]  ;;  %s380_s15 = scalar_lea.vmem %s1185_s1, %s1054_s6  ;;  %v363_v14 = vmax.f32 %v358_v7, %v361_v9  ;;  %s1096_s9 = sld [smem:[#allocation4 + $0x2b]] }
  0x4a   :  { %v104_v10 = vmax.f32 %v99_v4, %v102_v3  ;;  %v103_v11 = vadd.f32 %v102_v3, %v98_v5  ;;  %v371_v15 = vld [vmem:[%s370_s5] sm:$0x1]  ;;  %s385_s18 = scalar_lea.vmem %s1185_s1, %s1061_s27  ;;  %s263_s16 = scalar_lea.vmem %s1185_s1, %s1065_s20 }
  0x4b   :  { %v367_v18 = vadd.f32 %v366_v13, %v362_v12  ;;  %v376_v19 = vld [vmem:[%s375_s0] sm:$0x1]  ;;  %v368_v20 = vmax.f32 %v363_v14, %v366_v13  ;;  %s266_s21 = scalar_lea.vmem %s1185_s1, %s1071_s8  ;;  %s1110_s7 = sld [smem:[#allocation4 + $0x2c]] }
  0x4c   :  { %v109_v16 = vmax.f32 %v104_v10, %v107_v8  ;;  %v108_v17 = vadd.f32 %v107_v8, %v103_v11  ;;  %v381_v21 = vld [vmem:[%s380_s15] sm:$0x1]  ;;  %s271_s20 = scalar_lea.vmem %s1185_s1, %s1077_s17  ;;  %s1117_s14 = sld [smem:[#allocation4 + $0x2d]] }
  0x4d   :  { %v264_v22 = vld [vmem:[%s263_s16] sm:$0x1]  ;;  %v372_v24 = vadd.f32 %v371_v15, %v367_v18  ;;  %v373_v26 = vmax.f32 %v368_v20, %v371_v15  ;;  %s1119_s5 = sld [smem:[#allocation4 + $0x2e]]  ;;  %s1121_s8 = sld [smem:[#allocation4 + $0x2f]] }
  0x4e   :  { %118 = vrot.lane.b32.xlu0 %v109_v16, %s707_s25  ;;  %v110_v23 = vmul.f32 0.125, %v108_v17  ;;  %v267_v25 = vld [vmem:[%s266_s21] sm:$0x1]  ;;  %s390_s0 = scalar_lea.vmem %s1185_s1, %s1063_s12 }
  0x4f   :  { %v268_v27 = vadd.f32 %v267_v25, %v264_v22  ;;  %v272_v28 = vld [vmem:[%s271_s20] sm:$0x1]  ;;  %v269_v29 = vmax.f32 %v264_v22, %v267_v25  ;;  %v377_v30 = vadd.f32 %v376_v19, %v372_v24  ;;  %v378_v31 = vmax.f32 %v373_v26, %v376_v19  ;;  %s276_s23 = scalar_lea.vmem %s1185_s1, %s1096_s9 }
  0x50   :  { %v662_v32 = vld [vmem:[%s1186_s2] sm:$0xff]  }
  0x51   :  { %v386_v33 = vld [vmem:[%s385_s18] sm:$0x1]  ;;  %v273_v34 = vadd.f32 %v272_v28, %v268_v27  ;;  %v274_v35 = vmax.f32 %v269_v29, %v272_v28  ;;  %v382_v36 = vadd.f32 %v381_v21, %v377_v30  ;;  %v383_v38 = vmax.f32 %v378_v31, %v381_v21  ;;  %644 = vmatpush3.bf16.msra.mxu0 %v662_v32  ;;  %s281_s18 = scalar_lea.vmem %s1185_s1, %s1110_s7 }
  0x52   :  { %112 = vrot.lane.b32.xlu0 %v110_v23, %s708_s22  ;;  %v277_v37 = vld [vmem:[%s276_s23] sm:$0x1]  ;;  %645 = vmatprep.subr.bf16.mxu0 %v705_v6  ;;  %s286_s6 = scalar_lea.vmem %s1185_s1, %s1117_s14 }
  0x53   :  { %v391_v39 = vld [vmem:[%s390_s0] sm:$0x1]  ;;  %v278_v40 = vadd.f32 %v277_v37, %v273_v34  ;;  %v279_v41 = vmax.f32 %v274_v35, %v277_v37  ;;  %v387_v43 = vadd.f32 %v386_v33, %v382_v36  ;;  %s291_s27 = scalar_lea.vmem %s1185_s1, %s1119_s5  ;;  %s296_s20 = scalar_lea.vmem %s1185_s1, %s1121_s8  ;;  %v388_v50 = vmax.f32 %v383_v38, %v386_v33 }
  0x54   :  { %v282_v44 = vld [vmem:[%s281_s18] sm:$0x1] }
  0x55   :  { %v283_v45 = vadd.f32 %v282_v44, %v278_v40  ;;  %v287_v46 = vld [vmem:[%s286_s6] sm:$0x1]  ;;  %v284_v47 = vmax.f32 %v279_v41, %v282_v44  ;;  %v392_v48 = vadd.f32 %v391_v39, %v387_v43  ;;  %646 = vmatpush3.bf16.msra.mxu0 %v663_v42  ;;  %v393_v57 = vmax.f32 %v388_v50, %v391_v39 }
  0x56   :  { %v292_v49 = vld [vmem:[%s291_s27] sm:$0x1]  ;;  %647 = vmatprep.subr.bf16.mxu0 %v705_v6 }
  0x57   :  { %v288_v52 = vadd.f32 %v287_v46, %v283_v45  ;;  %v289_v53 = vmax.f32 %v284_v47, %v287_v46  ;;  %v394_v54 = vmul.f32 0.125, %v392_v48  ;;  %v297_v55 = vld [vmem:[%s296_s20] sm:$0x1] }
  0x58   :  { %v632_v13 = vld [vmem:[%s1187_s3] ss:$0 sm:$0xff] }
  0x59   :  { %v293_v56 = vadd.f32 %v292_v49, %v288_v52  ;;  %396 = vrot.lane.b32.xlu1 %v394_v54, %s708_s22  ;;  %648 = vmatpush3.bf16.msra.mxu0 %v664_v51  ;;  %v294_v60 = vmax.f32 %v289_v53, %v292_v49 }
  0x5a   :  { %649 = vmatprep.subr.bf16.mxu0 %v705_v6 }
  0x5b   :  { %v298_v59 = vadd.f32 %v297_v55, %v293_v56  ;;  %v299_v62 = vmax.f32 %v294_v60, %v297_v55 }
  0x5d   :  { %v300_v61 = vmul.f32 0.125, %v298_v59  ;;  %401 = vrot.lane.b32.xlu1 %v393_v57, %s707_s25  ;;  %650 = vmatpush3.bf16.msra.mxu0 %v665_v58 }
  0x5f   :  { %302 = vrot.lane.b32.xlu0 %v300_v61, %s708_s22  ;;  %s710_s22 = smov [#allocation5]  }
  0x60   :  { %s497_s5 = sshll.u32 %s710_s22, 4  ;;  %s498_s5 = int_to_ptr.vmem [resolvable:$true] %s497_s5 }
  0x61   :  { %s678_s8 = scalar_lea.vmem %s498_s5, 128  ;;  %p683_p6 = scmp.lt.s32.totalorder %s498_s5, %s498_s5 }
  0x62   :  { %p679_p5 = scmp.ne.s32.totalorder %s498_s5, %s678_s8  ;;  %p684_p7 = scmp.lt.s32.totalorder %s678_s8, %s678_s8 }
  0x63   :  { %307 = vrot.lane.b32.xlu0 %v299_v62, %s707_s25 }
  0x64   :  { %p685_p8 = por %p684_p7, %p683_p6 }
  0x66   :  { %p686_p9 = pnand %p685_p8, %p679_p5 }
  0x99   :  { %v259_v63 = vpop.permute.xlu1 %258 }
  0x9a   :  { %261 = vst.msk [vmem:[#allocation2 + $0x2] sm:$0x1] %vm70_vm3, %v259_v63 }
  0x9d   :  { %v68_v0 = vpop.permute.xlu0 %67 }
  0x9e   :  { %71 = vst.msk [vmem:[#allocation2] sm:$0x1] %vm70_vm3, %v68_v0 }
  0xa7   :  { %v353_v1 = vpop.permute.xlu1 %352 }
  0xa8   :  { %355 = vst.msk [vmem:[#allocation2 + $0x3] sm:$0x1] %vm70_vm3, %v353_v1 }
  0xb1   :  { %v165_v2 = vpop.permute.xlu0 %164 }
  0xb2   :  { %167 = vst.msk [vmem:[#allocation2 + $0x1] sm:$0x1] %vm70_vm3, %v165_v2 }
  0xb6   :  { %v214_v3 = vpop.permute.xlu1 %213 }
  0xba   :  { %v209_v6 = vpop.permute.xlu1 %208 }
  0xbb   :  { %211 = vst.msk [vmem:[#allocation2 + $0x1] sm:$0x1] %vm115_vm4, %v209_v6 }
  0xbc   :  { %216 = vst.msk [vmem:[#allocation2 + $0x1] sm:$0x1] %vm121_vm5, %v214_v3 }
  0xc0   :  { %v119_v4 = vpop.permute.xlu0 %118 }
  0xc4   :  { %v113_v5 = vpop.permute.xlu0 %112 }
  0xc5   :  { %116 = vst.msk [vmem:[#allocation2] sm:$0x1] %vm115_vm4, %v113_v5 }
  0xc6   :  { %122 = vst.msk [vmem:[#allocation2] sm:$0x1] %vm121_vm5, %v119_v4 }
  0xcb   :  { %v397_v7 = vpop.permute.xlu1 %396 }
  0xcc   :  { %399 = vst.msk [vmem:[#allocation2 + $0x3] sm:$0x1] %vm115_vm4, %v397_v7 }
  0xcf   :  { %v402_v8 = vpop.permute.xlu1 %401 }
  0xd0   :  { %404 = vst.msk [vmem:[#allocation2 + $0x3] sm:$0x1] %vm121_vm5, %v402_v8 }
  0xd1   :  { %v303_v9 = vpop.permute.xlu0 %302 }
  0xd2   :  { %305 = vst.msk [vmem:[#allocation2 + $0x2] sm:$0x1] %vm115_vm4, %v303_v9 }
  0xd5   :  { %v308_v10 = vpop.permute.xlu0 %307 }
  0xd6   :  { %310 = vst.msk [vmem:[#allocation2 + $0x2] sm:$0x1] %vm121_vm5, %v308_v10 }
  0xdd   :  { %v405_v11 = vld [vmem:[#allocation2] sm:$0xff] }
  0xde   :  { %v406_v12 = vpack.c.bf16 %v405_v11, %v405_v11 }
  0xe0   :  { %652 = vmatmul.mubr.msk.bf16.vlgmr.msra.gmra.mrb[0].mxu0 %vm23_vm0, %v406_v12 }
 0x1b3   :  { %v483_v14 = vpop.f32.mrb[0].mxu0 }
 0x1b4   :  { %v484_v15 = vadd.f32 %v632_v13, %v483_v14  ;;  %v653_v16 = vpop.f32.mrb[1].mxu0 }
 0x1b5   :  { %v486_v17 = vpop.f32.mrb[2].mxu0 }
 0x1b6   :  { %v654_v18 = vpop.f32.mrb[3].mxu0  ;;  %490 = vst.msk [vmem:[#allocation5] sm:$0xff] %vm489_vm6, %v484_v15 }
 0x1b7   :  { %689 = shalt.err (!%p686_p9)
}
 0x1b8   :  { %s690_s3 = scalar_lea.hbm %s1188_s4, 128 }
 0x1b9   :  { %p691_p10 = scmp.ne.s32.totalorder %s1188_s4, %s690_s3  ;;  %p694_p11 = scmp.lt.u32.totalorder %s690_s3, %s1188_s4 }
 0x1bb   :  { %p696_p12 = pnand %p694_p11, %p691_p10 }
 0x1bd   :  { %699 = shalt.err (!%p696_p12)
}
 0x1be   :  { %500 = dma.vmem_to_hbm [thread:$0]  %s498_s5, 128, %s1188_s4, [#allocation6]  }
 0x1bf   :  { %702 = dma.done.wait [#allocation6], 128  }
 0x1c0   :  { %703 = vsyncadd [#allocation6], 4294967168 }
 0x1c1   :  { %504 = vsyncpa [#allocation6], 1 }

</bundles_post_ra>
